<compile_context>
chip_gen: v7x
topology: tpu7x:2x2x1
jax: 0.10.0
libtpu: 0.0.40
codegen_flags: <defaults>
</compile_context>

<pallas_src>
import jax
import jax.numpy as jnp
from jax.experimental import pallas as pl
from jax.experimental.pallas import tpu as pltpu

_LANE = 128
_LANE_CANDIDATES = (4096, 2048, 1024, 512, 256, 128)
_MIN_GRID_STEPS = 4     # keep the pipeline overlapped and both v7x TCs busy


def _tile_budget():
    """Generation-aware (tile_bytes, vmem_limit_bytes) from physical VMEM size."""
    vmem_bytes = 64 * 1024 * 1024                 # conservative default (v7x per-TC)
    try:
        info = pltpu.get_tpu_info()
        vmem_bytes = int(getattr(info, "vmem_capacity_bytes", vmem_bytes))
    except Exception:
        pass
    if vmem_bytes >= 96 * 1024 * 1024:            # v5e / v6e: 128 MiB VMEM
        return 8 * 1024 * 1024, 64 * 1024 * 1024
    return 4 * 1024 * 1024, 32 * 1024 * 1024      # v7x: 64 MiB per TensorCore


def rezero_apply(x, g, fn=None, *, fn_is_elementwise=True):
    """Rezero forward: fn(x) * g, with the scale (and elementwise fn) in Pallas.

    x  : input array (e.g. NCHW).
    g  : learnable scalar parameter, shape (1,).
    fn : optional JAX-traceable wrapped sub-module.
         CONTRACT: if `fn_is_elementwise=True`, fn must be strictly pointwise
         (shape/axis independent) — it is applied to flattened (rows, lane)
         tiles, so per-axis ops (softmax, layernorm, per-channel scale, ...)
         would be silently wrong.  Pass fn_is_elementwise=False for those; they
         then run as plain-JAX glue before the Pallas scale kernel.
    """
    if fn is None:
        outer_fn, inner_fn = None, (lambda t: t)
    elif fn_is_elementwise:
        outer_fn, inner_fn = None, fn
    else:
        # TODO(synk): non-elementwise wrapped modules (conv/attention/...) have no
        # generic Pallas equivalent here; they run as plain JAX before the kernel.
        outer_fn, inner_fn = fn, (lambda t: t)

    y = x if outer_fn is None else outer_fn(x)
    orig_shape = y.shape
    dtype = y.dtype
    total = y.size
    itemsize = jnp.dtype(dtype).itemsize
    native_mul = itemsize < 4          # keep bf16/fp8 vregs packed (bf16 VALU on v6e/v7x)

    g_f32 = jnp.reshape(g, (1,)).astype(jnp.float32)

    def _scale(v):                     # same math as the kernel body (tail / tiny paths)
        s = g_f32[0].astype(dtype) if native_mul else g_f32[0]
        return (inner_fn(v) * s).astype(dtype)

    # Tiny inputs (< one lane): a kernel launch is pure overhead.
    if total < _LANE:
        return _scale(y)

    y_flat = jnp.ravel(y)              # contiguous reshape: no HBM copy
    rem = total % _LANE
    main = total - rem                 # kernel handles the 128-aligned prefix only
    y_main = y_flat[:main] if rem else y_flat

    # ---- lane-dense slab: widest lane that keeps rows >= sublane minimum --------
    min_sub = max(8, 32 // itemsize)   # 8 f32 / 16 bf16 / 32 int8|fp8
    lane = _LANE
    for cand in _LANE_CANDIDATES:
        if main % cand == 0 and main // cand >= min_sub:
            lane = cand
            break
    rows = main // lane
    y2d = y_main.reshape(rows, lane)

    # ---- row blocking: generation-aware tile size, >= _MIN_GRID_STEPS steps -----
    tile_bytes, vmem_limit = _tile_budget()
    target_rows = max(min_sub, tile_bytes // (lane * itemsize))
    block_rows = min(target_rows, pl.cdiv(rows, _MIN_GRID_STEPS))
    block_rows = ((block_rows + min_sub - 1) // min_sub) * min_sub   # sublane multiple
    block_rows = min(max(block_rows, min_sub), rows)
    grid = (pl.cdiv(rows, block_rows),)     # ragged last block is masked by Pallas

    def _kernel(g_ref, y_ref, o_ref):
        # g_ref: (1,) f32 scalar in SMEM; y_ref/o_ref: (block_rows, lane) VMEM tiles.
        s = g_ref[0].astype(dtype) if native_mul else g_ref[0]
        o_ref[...] = (inner_fn(y_ref[...]) * s).astype(o_ref.dtype)

    out2d = pl.pallas_call(
        _kernel,
        out_shape=jax.ShapeDtypeStruct((rows, lane), dtype),
        grid=grid,
        in_specs=[
            pl.BlockSpec(memory_space=pltpu.MemorySpace.SMEM),     # g (scalar, resident)
            pl.BlockSpec((block_rows, lane), lambda i: (i, 0)),    # fn(x) tile
        ],
        out_specs=pl.BlockSpec((block_rows, lane), lambda i: (i, 0)),
        compiler_params=pltpu.CompilerParams(
            dimension_semantics=("parallel",),   # mem-bound: shard steps across v7x TCs
            vmem_limit_bytes=vmem_limit,
        ),
    )(g_f32, y2d)

    out_flat = out2d.reshape(-1)
    if rem:
        # <128-element ragged tail: plain-JAX scale (no whole-array pad/slice copies).
        out_flat = jnp.concatenate([out_flat, _scale(y_flat[main:])])
    return out_flat.reshape(orig_shape)


if __name__ == "__main__":
    key = jax.random.PRNGKey(0)
    # Small NCHW input consistent with a conv-style wrapped fn.
    x = jax.random.normal(key, (2, 4, 16, 16), dtype=jnp.float32)

    # g = 0 init, matching nn.Parameter(torch.zeros(1)); fn = identity.
    g0 = jnp.zeros((1,), dtype=jnp.float32)
    out0 = jax.block_until_ready(rezero_apply(x, g0))
    assert out0.shape == x.shape and out0.dtype == x.dtype
    assert jnp.allclose(out0, jnp.zeros_like(x), atol=1e-6)

    # Nonzero g (as after training updates), identity fn.
    g1 = jnp.array([0.37], dtype=jnp.float32)
    out1 = jax.block_until_ready(rezero_apply(x, g1))
    assert jnp.allclose(out1, x * 0.37, atol=1e-6, rtol=1e-6)

    # Fused elementwise wrapped fn (applied on the VPU inside the kernel).
    g2 = jnp.array([0.5], dtype=jnp.float32)
    out2 = jax.block_until_ready(rezero_apply(x, g2, fn=jnp.tanh))
    assert jnp.allclose(out2, jnp.tanh(x) * 0.5, atol=1e-5, rtol=1e-5)

    # bf16 input exercises the dtype-aware sublane blocking + native-dtype multiply.
    xb = x.astype(jnp.bfloat16)
    out3 = jax.block_until_ready(rezero_apply(xb, g1))
    ref3 = (xb * jnp.bfloat16(0.37)).astype(jnp.bfloat16)
    assert out3.dtype == jnp.bfloat16
    assert jnp.allclose(out3.astype(jnp.float32), ref3.astype(jnp.float32),
                        atol=1e-2, rtol=1e-2)

    # Ragged tail (total % 128 != 0): kernel on the aligned prefix, plain-JAX tail.
    xr = jax.random.normal(jax.random.PRNGKey(1), (3, 67), dtype=jnp.float32)
    out4 = jax.block_until_ready(rezero_apply(xr, g1))
    assert out4.shape == xr.shape
    assert jnp.allclose(out4, xr * 0.37, atol=1e-6, rtol=1e-6)

    # Tiny input (< 128 elements): pure plain-JAX path.
    xt = jax.random.normal(jax.random.PRNGKey(2), (3, 5, 7), dtype=jnp.float32)
    out5 = jax.block_until_ready(rezero_apply(xt, g2, fn=jnp.tanh))
    assert jnp.allclose(out5, jnp.tanh(xt) * 0.5, atol=1e-5, rtol=1e-5)

    print("KERNEL_OK")
</pallas_src>

<mosaic_0001>
module attributes {stable_mosaic.version = 11 : i64} {
  func.func @_kernel(%arg0: i32, %arg1: memref<1xf32, #tpu.memory_space<smem>>, %arg2: memref<8x256xf32, #tpu.memory_space<vmem>>, %arg3: memref<8x256xf32, #tpu.memory_space<vmem>>) attributes {dimension_semantics = [#tpu.dimension_semantics<parallel>], iteration_bounds = array<i64: 1>, scalar_prefetch = 0 : i64, scratch_operands = 0 : i64, tpu.core_type = #tpu.core_type<tc>, window_params = [{transform_indices = @transform_0, window_bounds = array<i64: 1>}, {transform_indices = @transform_1, window_bounds = array<i64: 8, 256>}, {transform_indices = @transform_2, window_bounds = array<i64: 8, 256>}]} {
    %c0 = arith.constant 0 : index
    %0 = memref.load %arg1[%c0] : memref<1xf32, #tpu.memory_space<smem>>
    %c0_0 = arith.constant 0 : index
    %c0_1 = arith.constant 0 : index
    %1 = vector.load %arg2[%c0_0, %c0_1] : memref<8x256xf32, #tpu.memory_space<vmem>>, vector<8x256xf32>
    %2 = vector.broadcast %0 : f32 to vector<8x256xf32>
    %3 = arith.mulf %1, %2 : vector<8x256xf32>
    %c0_2 = arith.constant 0 : index
    %c0_3 = arith.constant 0 : index
    %4 = vector.load %arg3[%c0_2, %c0_3] : memref<8x256xf32, #tpu.memory_space<vmem>>, vector<8x256xf32>
    tpu.vector_store %arg3[%c0_2, %c0_3], %3 {strides = array<i32>} : memref<8x256xf32, #tpu.memory_space<vmem>>, vector<8x256xf32>,
    return
  }
  func.func @transform_0(%arg0: i32) -> i32 {
    %c0_i32 = arith.constant 0 : i32
    %c0_i32_0 = arith.constant 0 : i32
    return %c0_i32 : i32
  }
  func.func @transform_1(%arg0: i32) -> (i32, i32) {
    %c0_i32 = arith.constant 0 : i32
    %c0_i32_0 = arith.constant 0 : i32
    return %arg0, %c0_i32 : i32, i32
  }
  func.func @transform_2(%arg0: i32) -> (i32, i32) {
    %c0_i32 = arith.constant 0 : i32
    %c0_i32_0 = arith.constant 0 : i32
    return %arg0, %c0_i32 : i32, i32
  }
}

</mosaic_0001>

<bundles_post_ra>
// kernel: tpu_custom_call.1
= control target key start
LH: loop header
LB: loop body
LE: loop exit
PB: predicated region body
PF: predicated region fallthrough
CT: control target
= control target key end

     0   :  { %8 = vsyncpa [#allocation4], 0  ;;  %s142_s0 = inlined_call_operand.<no memory space> [shape: f32[1], index: 0, kind: input, shape index: {}]   ;;  %s143_s1 = inlined_call_operand.hbm [shape: f32[8,256], index: 1, kind: input, shape index: {}]   ;;  %s144_s2 = inlined_call_operand.hbm [shape: f32[8,256], index: 2, kind: output, shape index: {}]  }
   0x1   :  { %9 = vsyncpa [#allocation5], 0  ;;  %s98_s9 = smov [#allocation3]   ;;  %s50_s13 = scalar_lea.hbm %s143_s1, 256 }
   0x2   :  { %s18_s10 = sshll.u32 %s98_s9, 4  ;;  %p51_p0 = scmp.ne.s32.totalorder %s143_s1, %s50_s13  ;;  %s19_s10 = int_to_ptr.vmem [resolvable:$true] %s18_s10 }
   0x3   :  { %p54_p1 = scmp.lt.u32.totalorder %s50_s13, %s143_s1 }
   0x5   :  { %p56_p2 = pnand %p54_p1, %p51_p0 }
   0x7   :  { %59 = shalt.err (!%p56_p2)
}
   0x8   :  { %s60_s18 = scalar_lea.vmem %s19_s10, 256  ;;  %p65_p4 = scmp.lt.s32.totalorder %s19_s10, %s19_s10 }
   0x9   :  { %p61_p3 = scmp.ne.s32.totalorder %s19_s10, %s60_s18  ;;  %p66_p5 = scmp.lt.s32.totalorder %s60_s18, %s60_s18 }
   0xb   :  { %p67_p6 = por %p66_p5, %p65_p4 }
   0xd   :  { %p68_p7 = pnand %p67_p6, %p61_p3 }
   0xf   :  { %71 = shalt.err (!%p68_p7)
}
  0x10   :  { %21 = dma.hbm_to_vmem [thread:$0]  %s143_s1, 256, %s19_s10, [#allocation4]  }
  0x11   :  { %94 = dma.done.wait [#allocation4], 256  }
  0x12   :  { %95 = vsyncadd [#allocation4], 4294967040  ;;  %v28_v0 = vstv %s142_s0  ;;  %s99_s23 = smov [#allocation6]   ;;  %v26_v1 = vld [vmem:[#allocation3] sm:$0xff]  ;;  %v27_v2 = vld [vmem:[#allocation3 + $0x8] sm:$0xff] }
  0x13   :  { %s39_s24 = sshll.u32 %s99_s23, 4  ;;  %v29_v3 = vmul.f32 %v28_v0, %v26_v1  ;;  %v30_v4 = vmul.f32 %v28_v0, %v27_v2  ;;  %s40_s24 = int_to_ptr.vmem [resolvable:$true] %s39_s24 }
  0x14   :  { %s72_s25 = scalar_lea.vmem %s40_s24, 256  ;;  %p77_p9 = scmp.lt.s32.totalorder %s40_s24, %s40_s24 }
  0x15   :  { %31 = vst [vmem:[#allocation6] sm:$0xff] %v29_v3  ;;  %32 = vst [vmem:[#allocation6 + $0x8] sm:$0xff] %v30_v4  ;;  %p73_p8 = scmp.ne.s32.totalorder %s40_s24, %s72_s25  ;;  %p78_p10 = scmp.lt.s32.totalorder %s72_s25, %s72_s25 }
  0x17   :  { %p79_p11 = por %p78_p10, %p77_p9 }
  0x19   :  { %p80_p12 = pnand %p79_p11, %p73_p8 }
  0x1b   :  { %83 = shalt.err (!%p80_p12)
}
  0x1c   :  { %s84_s0 = scalar_lea.hbm %s144_s2, 256 }
  0x1d   :  { %p85_p13 = scmp.ne.s32.totalorder %s144_s2, %s84_s0  ;;  %p88_p0 = scmp.lt.u32.totalorder %s84_s0, %s144_s2 }
  0x1f   :  { %p90_p1 = pnand %p88_p0, %p85_p13 }
  0x21   :  { %93 = shalt.err (!%p90_p1)
}
  0x22   :  { %42 = dma.vmem_to_hbm [thread:$0]  %s40_s24, 256, %s144_s2, [#allocation5]  }
  0x23   :  { %96 = dma.done.wait [#allocation5], 256  }
  0x24   :  { %97 = vsyncadd [#allocation5], 4294967040 }
  0x25   :  { %46 = vsyncpa [#allocation4], 1 }
  0x26   :  { %47 = vsyncpa [#allocation5], 1 }

</bundles_post_ra>
